<compile_context>
chip_gen: v5e
topology: v5e:2x2
jax: 0.10.0
libtpu: 0.0.40
codegen_flags: <defaults>
</compile_context>

<pallas_src>
import jax
import jax.numpy as jnp
from jax.experimental import pallas as pl
from jax.experimental.pallas import tpu as pltpu


def _round_up(x, m):
    return ((x + m - 1) // m) * m


def _neuron2_kernel(x_ref, wt_ref, b_ref, o_sig_ref, o_sm_ref):
    # x_ref: (TB, D)  wt_ref: (D, T)  b_ref: (1, T)  outputs: (TB, T)
    x = x_ref[...]
    wt = wt_ref[...]
    b = b_ref[...]

    # Shared Linear weights, two logit sets: one from (x + 10), one from x.
    z_sig = jnp.dot(x + jnp.float32(10.0), wt,
                    preferred_element_type=jnp.float32) + b
    z_sm = jnp.dot(x, wt, preferred_element_type=jnp.float32) + b

    # Output 1: sigmoid(Linear(x + 10))
    o_sig_ref[...] = jax.nn.sigmoid(z_sig).astype(o_sig_ref.dtype)

    # Output 2: softmax(Linear(x)) over the target axis (torch dim=1).
    m = jnp.max(z_sm, axis=-1, keepdims=True)
    e = jnp.exp(z_sm - m)
    s = jnp.sum(e, axis=-1, keepdims=True)
    o_sm_ref[...] = (e / s).astype(o_sm_ref.dtype)


def neuron2outputs_forward(x, weight, bias, *, block_b=256):
    """(sigmoid((x+10) @ W.T + b), softmax(x @ W.T + b, axis=1)) as one fused
    Pallas TPU kernel, tiled over the batch dimension.

    x:      (B, D) float32
    weight: (T, D) float32   (torch Linear layout)
    bias:   (T,)   float32
    """
    B, D = x.shape
    T = weight.shape[0]

    wt = weight.T                 # (D, T) so kernel does x @ wt
    b2 = bias.reshape(1, T)       # (1, T) for broadcast inside the kernel

    # Batch tile: multiple of 8 sublanes; pad B so every block is full
    # (avoids ragged masked stores / short DMAs on the last block).
    tb = min(block_b, _round_up(B, 8))
    Bp = _round_up(B, tb)
    if Bp != B:
        x = jnp.pad(x, ((0, Bp - B), (0, 0)))

    grid = (Bp // tb,)

    out_sig, out_sm = pl.pallas_call(
        _neuron2_kernel,
        out_shape=(
            jax.ShapeDtypeStruct((Bp, T), x.dtype),
            jax.ShapeDtypeStruct((Bp, T), x.dtype),
        ),
        grid_spec=pltpu.PrefetchScalarGridSpec(
            num_scalar_prefetch=0,
            grid=grid,
            in_specs=[
                pl.BlockSpec((tb, D), lambda i: (i, 0)),   # batch tile of x
                pl.BlockSpec((D, T), lambda i: (0, 0)),    # weights, resident
                pl.BlockSpec((1, T), lambda i: (0, 0)),    # bias, resident
            ],
            out_specs=(
                pl.BlockSpec((tb, T), lambda i: (i, 0)),
                pl.BlockSpec((tb, T), lambda i: (i, 0)),
            ),
        ),
        compiler_params=pltpu.CompilerParams(
            # Batch tiles are fully independent -> parallel (v7x megacore).
            dimension_semantics=("parallel",),
            # Explicit budget so the kernel compiles identically on v7x's
            # smaller (64 MiB) VMEM; double-buffered tiles stay far below it.
            vmem_limit_bytes=32 * 1024 * 1024,
        ),
        cost_estimate=pl.CostEstimate(
            flops=4 * Bp * D * T,                    # two (TB,D)x(D,T) matmuls
            transcendentals=2 * Bp * T,              # sigmoid + softmax exp
            bytes_accessed=4 * (Bp * D + D * T + T + 2 * Bp * T),
        ),
    )(x, wt, b2)

    if Bp != B:
        out_sig = out_sig[:B]
        out_sm = out_sm[:B]
    return out_sig, out_sm


if __name__ == "__main__":
    # Shapes implied by the module defaults / _get_random_inputs: x = (1, 1000).
    n_dims, n_targets, batch = 1000, 100, 1

    key = jax.random.PRNGKey(0)
    kx, kw, kb = jax.random.split(key, 3)

    # torch.nn.Linear-like uniform init.
    bound = 1.0 / (n_dims ** 0.5)
    weight = jax.random.uniform(
        kw, (n_targets, n_dims), jnp.float32, minval=-bound, maxval=bound
    )  # torch layout (out, in)
    bias = jax.random.uniform(
        kb, (n_targets,), jnp.float32, minval=-bound, maxval=bound
    )
    x = jax.random.normal(kx, (batch, n_dims), jnp.float32)

    out_sig, out_sm = neuron2outputs_forward(x, weight, bias)
    jax.block_until_ready((out_sig, out_sm))

    # Plain-JAX reference matching the torch forward semantics.
    ref_sig = jax.nn.sigmoid((x + 10.0) @ weight.T + bias)
    ref_sm = jax.nn.softmax(x @ weight.T + bias, axis=1)

    assert out_sig.shape == (batch, n_targets)
    assert out_sm.shape == (batch, n_targets)
    assert jnp.allclose(out_sig, ref_sig, atol=5e-5, rtol=5e-5)
    assert jnp.allclose(out_sm, ref_sm, atol=5e-5, rtol=5e-5)

    print("KERNEL_OK")
</pallas_src>

<mosaic_0001>
module attributes {stable_mosaic.version = 11 : i64} {
  func.func @_neuron2_kernel(%arg0: i32, %arg1: memref<8x1000xf32, #tpu.memory_space<vmem>>, %arg2: memref<1000x100xf32, #tpu.memory_space<vmem>>, %arg3: memref<1x100xf32, #tpu.memory_space<vmem>>, %arg4: memref<8x100xf32, #tpu.memory_space<vmem>>, %arg5: memref<8x100xf32, #tpu.memory_space<vmem>>) attributes {dimension_semantics = [#tpu.dimension_semantics<parallel>], iteration_bounds = array<i64: 1>, scalar_prefetch = 0 : i64, scratch_operands = 0 : i64, tpu.core_type = #tpu.core_type<tc>, window_params = [{transform_indices = @transform_0, window_bounds = array<i64: 8, 1000>}, {pipeline_mode = #tpu.pipeline_mode<synchronous>, transform_indices = @transform_1, window_bounds = array<i64: 1000, 100>}, {pipeline_mode = #tpu.pipeline_mode<synchronous>, transform_indices = @transform_2, window_bounds = array<i64: 1, 100>}, {transform_indices = @transform_3, window_bounds = array<i64: 8, 100>}, {transform_indices = @transform_4, window_bounds = array<i64: 8, 100>}]} {
    %c0 = arith.constant 0 : index
    %c0_0 = arith.constant 0 : index
    %0 = vector.load %arg1[%c0, %c0_0] : memref<8x1000xf32, #tpu.memory_space<vmem>>, vector<8x1000xf32>
    %c0_1 = arith.constant 0 : index
    %c0_2 = arith.constant 0 : index
    %1 = vector.load %arg2[%c0_1, %c0_2] : memref<1000x100xf32, #tpu.memory_space<vmem>>, vector<1000x100xf32>
    %c0_3 = arith.constant 0 : index
    %c0_4 = arith.constant 0 : index
    %2 = vector.load %arg3[%c0_3, %c0_4] : memref<1x100xf32, #tpu.memory_space<vmem>>, vector<1x100xf32>
    %cst = arith.constant 1.000000e+01 : f32
    %3 = vector.broadcast %cst : f32 to vector<8x1000xf32>
    %4 = arith.addf %0, %3 : vector<8x1000xf32>
    %cst_5 = arith.constant dense<0.000000e+00> : vector<8x100xf32>
    %5 = tpu.matmul %4, %1, %cst_5 {dimension_numbers = #tpu.dot_dimension_numbers<[1], [0], [0], [1], [0, 0, 1, 1], [], []>} : vector<8x1000xf32>, vector<1000x100xf32>, vector<8x100xf32> -> vector<8x100xf32>
    %6 = vector.broadcast %2 : vector<1x100xf32> to vector<8x100xf32>
    %7 = arith.addf %5, %6 : vector<8x100xf32>
    %cst_6 = arith.constant dense<0.000000e+00> : vector<8x100xf32>
    %8 = tpu.matmul %0, %1, %cst_6 {dimension_numbers = #tpu.dot_dimension_numbers<[1], [0], [0], [1], [0, 0, 1, 1], [], []>} : vector<8x1000xf32>, vector<1000x100xf32>, vector<8x100xf32> -> vector<8x100xf32>
    %9 = vector.broadcast %2 : vector<1x100xf32> to vector<8x100xf32>
    %10 = arith.addf %8, %9 : vector<8x100xf32>
    %11 = arith.negf %7 : vector<8x100xf32>
    %12 = math.exp %11 : vector<8x100xf32>
    %cst_7 = arith.constant 1.000000e+00 : f32
    %13 = vector.broadcast %cst_7 : f32 to vector<8x100xf32>
    %14 = arith.addf %13, %12 : vector<8x100xf32>
    %15 = arith.divf %13, %14 : vector<8x100xf32>
    %c0_8 = arith.constant 0 : index
    %c0_9 = arith.constant 0 : index
    %16 = vector.load %arg4[%c0_8, %c0_9] : memref<8x100xf32, #tpu.memory_space<vmem>>, vector<8x100xf32>
    tpu.vector_store %arg4[%c0_8, %c0_9], %15 {strides = array<i32>} : memref<8x100xf32, #tpu.memory_space<vmem>>, vector<8x100xf32>,
    %cst_10 = arith.constant dense<0xFF800000> : vector<8xf32>
    %17 = vector.multi_reduction <maximumf>, %10, %cst_10 [1] : vector<8x100xf32> to vector<8xf32>
    %18 = vector.shape_cast %17 : vector<8xf32> to vector<8x1xf32>
    %19 = vector.broadcast %18 : vector<8x1xf32> to vector<8x100xf32>
    %20 = arith.subf %10, %19 : vector<8x100xf32>
    %21 = math.exp %20 : vector<8x100xf32>
    %cst_11 = arith.constant dense<0.000000e+00> : vector<8xf32>
    %22 = vector.multi_reduction <add>, %21, %cst_11 [1] : vector<8x100xf32> to vector<8xf32>
    %23 = vector.shape_cast %22 : vector<8xf32> to vector<8x1xf32>
    %24 = vector.broadcast %23 : vector<8x1xf32> to vector<8x100xf32>
    %25 = arith.divf %21, %24 : vector<8x100xf32>
    %c0_12 = arith.constant 0 : index
    %c0_13 = arith.constant 0 : index
    %26 = vector.load %arg5[%c0_12, %c0_13] : memref<8x100xf32, #tpu.memory_space<vmem>>, vector<8x100xf32>
    tpu.vector_store %arg5[%c0_12, %c0_13], %25 {strides = array<i32>} : memref<8x100xf32, #tpu.memory_space<vmem>>, vector<8x100xf32>,
    return
  }
  func.func @transform_0(%arg0: i32) -> (i32, i32) {
    %c0_i32 = arith.constant 0 : i32
    %c0_i32_0 = arith.constant 0 : i32
    return %arg0, %c0_i32 : i32, i32
  }
  func.func @transform_1(%arg0: i32) -> (i32, i32) {
    %c0_i32 = arith.constant 0 : i32
    %c0_i32_0 = arith.constant 0 : i32
    %c0_i32_1 = arith.constant 0 : i32
    return %c0_i32, %c0_i32_0 : i32, i32
  }
  func.func @transform_2(%arg0: i32) -> (i32, i32) {
    %c0_i32 = arith.constant 0 : i32
    %c0_i32_0 = arith.constant 0 : i32
    %c0_i32_1 = arith.constant 0 : i32
    return %c0_i32, %c0_i32_0 : i32, i32
  }
  func.func @transform_3(%arg0: i32) -> (i32, i32) {
    %c0_i32 = arith.constant 0 : i32
    %c0_i32_0 = arith.constant 0 : i32
    return %arg0, %c0_i32 : i32, i32
  }
  func.func @transform_4(%arg0: i32) -> (i32, i32) {
    %c0_i32 = arith.constant 0 : i32
    %c0_i32_0 = arith.constant 0 : i32
    return %arg0, %c0_i32 : i32, i32
  }
}

</mosaic_0001>

<bundles_post_ra>
// kernel: tpu_custom_call.1
= control target key start
LH: loop header
LB: loop body
LE: loop exit
PB: predicated region body
PF: predicated region fallthrough
CT: control target
= control target key end

     0   :  { %10 = vsyncpa [#allocation3], 0  ;;  %s1607_s0 = inlined_call_operand.vmem [shape: f32[8,1000], index: 0, kind: input, shape index: {}]   ;;  %s1608_s1 = inlined_call_operand.vmem [shape: f32[1000,100], index: 1, kind: input, shape index: {}]   ;;  %s1609_s2 = inlined_call_operand.vmem [shape: f32[1,100], index: 2, kind: input, shape index: {}]   ;;  %s1610_s3 = inlined_call_operand.hbm [shape: f32[8,100], index: 3, kind: output, shape index: {0}]   ;;  %s1611_s4 = inlined_call_operand.hbm [shape: f32[8,100], index: 4, kind: output, shape index: {1}]  }
   0x1   :  { %v664_v0 = vld [vmem:[%s1608_s1 + $0x178] sm:$0xff]  ;;  %v681_v3 = vld [vmem:[%s1608_s1 + $0x170] sm:$0xff]  ;;  %v702_v7 = vld [vmem:[%s1608_s1 + $0x168] sm:$0xff] }
   0x2   :  { %v669_v1 = vld [vmem:[%s1608_s1 + $0x1f8] sm:$0xff]  ;;  %207 = vmatpush.msra.mxu2 %v664_v0  ;;  %v686_v4 = vld [vmem:[%s1608_s1 + $0x1f0] sm:$0xff]  ;;  %v707_v8 = vld [vmem:[%s1608_s1 + $0x1e8] sm:$0xff] }
   0x3   :  { %v674_v2 = vld [vmem:[%s1608_s1 + $0x78] sm:$0xff]  ;;  %227 = vmatpush.msra.mxu3 %v669_v1  ;;  %v691_v5 = vld [vmem:[%s1608_s1 + $0x70] sm:$0xff]  ;;  %v714_v9 = vld [vmem:[%s1608_s1 + $0x68] sm:$0xff] }
   0x4   :  { %167 = vmatpush.msra.mxu0 %v674_v2  ;;  %v697_v6 = vld [vmem:[%s1608_s1 + $0xf8] sm:$0xff]  ;;  %208 = vmatpush.msra.mxu2 %v681_v3  ;;  %v719_v10 = vld [vmem:[%s1608_s1 + $0xf0] sm:$0xff]  ;;  %v726_v11 = vld [vmem:[%s1608_s1 + $0x160] sm:$0xff] }
   0x5   :  { %228 = vmatpush.msra.mxu3 %v686_v4  ;;  %187 = vmatpush.msra.mxu1 %v697_v6  ;;  %v731_v12 = vld [vmem:[%s1608_s1 + $0x1e0] sm:$0xff]  ;;  %v743_v14 = vld [vmem:[%s1608_s1 + $0xe8] sm:$0xff]  ;;  %v750_v15 = vld [vmem:[%s1608_s1 + $0x158] sm:$0xff] }
   0x6   :  { %168 = vmatpush.msra.mxu0 %v691_v5  ;;  %209 = vmatpush.msra.mxu2 %v702_v7  ;;  %v738_v13 = vld [vmem:[%s1608_s1 + $0x60] sm:$0xff]  ;;  %v755_v16 = vld [vmem:[%s1608_s1 + $0x1d8] sm:$0xff]  ;;  %v774_v19 = vld [vmem:[%s1608_s1 + $0x150] sm:$0xff] }
   0x7   :  { %229 = vmatpush.msra.mxu3 %v707_v8  ;;  %188 = vmatpush.msra.mxu1 %v719_v10  ;;  %v762_v17 = vld [vmem:[%s1608_s1 + $0x58] sm:$0xff]  ;;  %v767_v18 = vld [vmem:[%s1608_s1 + $0xe0] sm:$0xff]  ;;  %v779_v20 = vld [vmem:[%s1608_s1 + $0x1d0] sm:$0xff] }
   0x8   :  { %169 = vmatpush.msra.mxu0 %v714_v9  ;;  %210 = vmatpush.msra.mxu2 %v726_v11  ;;  %v786_v21 = vld [vmem:[%s1608_s1 + $0x50] sm:$0xff]  ;;  %v791_v22 = vld [vmem:[%s1608_s1 + $0xd8] sm:$0xff]  ;;  %v798_v23 = vld [vmem:[%s1608_s1 + $0x148] sm:$0xff] }
   0x9   :  { %230 = vmatpush.msra.mxu3 %v731_v12  ;;  %189 = vmatpush.msra.mxu1 %v743_v14  ;;  %v803_v24 = vld [vmem:[%s1608_s1 + $0x1c8] sm:$0xff]  ;;  %v815_v26 = vld [vmem:[%s1608_s1 + $0xd0] sm:$0xff]  ;;  %v822_v27 = vld [vmem:[%s1608_s1 + $0x140] sm:$0xff] }
   0xa   :  { %170 = vmatpush.msra.mxu0 %v738_v13  ;;  %211 = vmatpush.msra.mxu2 %v750_v15  ;;  %v810_v25 = vld [vmem:[%s1608_s1 + $0x48] sm:$0xff]  ;;  %v827_v28 = vld [vmem:[%s1608_s1 + $0x1c0] sm:$0xff]  ;;  %v846_v31 = vld [vmem:[%s1608_s1 + $0x138] sm:$0xff] }
   0xb   :  { %231 = vmatpush.msra.mxu3 %v755_v16  ;;  %190 = vmatpush.msra.mxu1 %v767_v18  ;;  %v834_v29 = vld [vmem:[%s1608_s1 + $0x40] sm:$0xff]  ;;  %v839_v30 = vld [vmem:[%s1608_s1 + $0xc8] sm:$0xff]  ;;  %v851_v32 = vld [vmem:[%s1608_s1 + $0x1b8] sm:$0xff] }
   0xc   :  { %171 = vmatpush.msra.mxu0 %v762_v17  ;;  %212 = vmatpush.msra.mxu2 %v774_v19  ;;  %v858_v33 = vld [vmem:[%s1608_s1 + $0x38] sm:$0xff]  ;;  %v863_v34 = vld [vmem:[%s1608_s1 + $0xc0] sm:$0xff]  ;;  %v870_v35 = vld [vmem:[%s1608_s1 + $0x130] sm:$0xff] }
   0xd   :  { %232 = vmatpush.msra.mxu3 %v779_v20  ;;  %191 = vmatpush.msra.mxu1 %v791_v22  ;;  %v875_v36 = vld [vmem:[%s1608_s1 + $0x1b0] sm:$0xff]  ;;  %v887_v38 = vld [vmem:[%s1608_s1 + $0xb8] sm:$0xff]  ;;  %v894_v39 = vld [vmem:[%s1608_s1 + $0x128] sm:$0xff] }
   0xe   :  { %172 = vmatpush.msra.mxu0 %v786_v21  ;;  %213 = vmatpush.msra.mxu2 %v798_v23  ;;  %v882_v37 = vld [vmem:[%s1608_s1 + $0x30] sm:$0xff]  ;;  %v899_v40 = vld [vmem:[%s1608_s1 + $0x1a8] sm:$0xff]  ;;  %v918_v43 = vld [vmem:[%s1608_s1 + $0x120] sm:$0xff] }
   0xf   :  { %233 = vmatpush.msra.mxu3 %v803_v24  ;;  %192 = vmatpush.msra.mxu1 %v815_v26  ;;  %v906_v41 = vld [vmem:[%s1608_s1 + $0x28] sm:$0xff]  ;;  %v911_v42 = vld [vmem:[%s1608_s1 + $0xb0] sm:$0xff]  ;;  %1682 = vst [vmem:[#allocation8_spill] sm:$0xff] %v918_v43  ;;  %v923_v44 = vld [vmem:[%s1608_s1 + $0x1a0] sm:$0xff] }
  0x10   :  { %173 = vmatpush.msra.mxu0 %v810_v25  ;;  %214 = vmatpush.msra.mxu2 %v822_v27  ;;  %v930_v45 = vld [vmem:[%s1608_s1 + $0x20] sm:$0xff]  ;;  %v935_v46 = vld [vmem:[%s1608_s1 + $0xa8] sm:$0xff]  ;;  %v942_v47 = vld [vmem:[%s1608_s1 + $0x118] sm:$0xff] }
  0x11   :  { %234 = vmatpush.msra.mxu3 %v827_v28  ;;  %193 = vmatpush.msra.mxu1 %v839_v30  ;;  %1683 = vst [vmem:[#allocation9_spill] sm:$0xff] %v942_v47  ;;  %v947_v48 = vld [vmem:[%s1608_s1 + $0x198] sm:$0xff]  ;;  %v959_v50 = vld [vmem:[%s1608_s1 + $0xa0] sm:$0xff]  ;;  %v966_v51 = vld [vmem:[%s1608_s1 + $0x110] sm:$0xff] }
  0x12   :  { %174 = vmatpush.msra.mxu0 %v834_v29  ;;  %215 = vmatpush.msra.mxu2 %v846_v31  ;;  %1684 = vst [vmem:[#allocation10_spill] sm:$0xff] %v947_v48  ;;  %v954_v49 = vld [vmem:[%s1608_s1 + $0x18] sm:$0xff]  ;;  %v971_v52 = vld [vmem:[%s1608_s1 + $0x190] sm:$0xff]  ;;  %v990_v55 = vld [vmem:[%s1608_s1 + $0x108] sm:$0xff] }
  0x13   :  { %235 = vmatpush.msra.mxu3 %v851_v32  ;;  %194 = vmatpush.msra.mxu1 %v863_v34  ;;  %1685 = vst [vmem:[#allocation11_spill] sm:$0xff] %v966_v51  ;;  %v978_v53 = vld [vmem:[%s1608_s1 + $0x10] sm:$0xff]  ;;  %v983_v54 = vld [vmem:[%s1608_s1 + $0x98] sm:$0xff]  ;;  %v995_v56 = vld [vmem:[%s1608_s1 + $0x188] sm:$0xff] }
  0x14   :  { %175 = vmatpush.msra.mxu0 %v858_v33  ;;  %216 = vmatpush.msra.mxu2 %v870_v35  ;;  %1686 = vst [vmem:[#allocation12_spill] sm:$0xff] %v971_v52  ;;  %v1002_v57 = vld [vmem:[%s1608_s1 + $0x8] sm:$0xff]  ;;  %v1007_v58 = vld [vmem:[%s1608_s1 + $0x90] sm:$0xff]  ;;  %v1014_v59 = vld [vmem:[%s1608_s1 + $0x100] sm:$0xff] }
  0x15   :  { %236 = vmatpush.msra.mxu3 %v875_v36  ;;  %195 = vmatpush.msra.mxu1 %v887_v38  ;;  %1687 = vst [vmem:[#allocation13_spill] sm:$0xff] %v983_v54  ;;  %v1019_v60 = vld [vmem:[%s1608_s1 + $0x180] sm:$0xff]  ;;  %v1026_v61 = vld [vmem:[%s1608_s1 + $0x378] sm:$0xff] }
  0x16   :  { %176 = vmatpush.msra.mxu0 %v882_v37  ;;  %217 = vmatpush.msra.mxu2 %v894_v39  ;;  %1688 = vst [vmem:[#allocation14_spill] sm:$0xff] %v990_v55  ;;  %v1031_v62 = vld [vmem:[%s1608_s1 + $0x3e0] sm:$0xff] }
  0x17   :  { %237 = vmatpush.msra.mxu3 %v899_v40  ;;  %196 = vmatpush.msra.mxu1 %v911_v42  ;;  %1689 = vst [vmem:[#allocation15_spill] sm:$0xff] %v995_v56  ;;  %v1038_v63 = vld [vmem:[%s1608_s1] sm:$0xff] }
  0x18   :  { %177 = vmatpush.msra.mxu0 %v906_v41  ;;  %218 = vmatpush.msra.mxu2 %v918_v43  ;;  %1690 = vst [vmem:[#allocation16_spill] sm:$0xff] %v1007_v58 }
  0x19   :  { %238 = vmatpush.msra.mxu3 %v923_v44  ;;  %197 = vmatpush.msra.mxu1 %v935_v46  ;;  %1691 = vst [vmem:[#allocation17_spill] sm:$0xff] %v1014_v59 }
  0x1a   :  { %178 = vmatpush.msra.mxu0 %v930_v45  ;;  %219 = vmatpush.msra.mxu2 %v942_v47  ;;  %1692 = vst [vmem:[#allocation18_spill] sm:$0xff] %v1019_v60  ;;  %v1098_v47 = vld [vmem:[%s1608_s1 + $0x268] sm:$0xff] }
  0x1b   :  { %239 = vmatpush.msra.mxu3 %v947_v48  ;;  %198 = vmatpush.msra.mxu1 %v959_v50  ;;  %1693 = vst [vmem:[#allocation19_spill] sm:$0xff] %v1026_v61 }
  0x1c   :  { %179 = vmatpush.msra.mxu0 %v954_v49  ;;  %220 = vmatpush.msra.mxu2 %v966_v51  ;;  %1694 = vst [vmem:[#allocation20_spill] sm:$0xff] %v1031_v62  ;;  %v1055_v51 = vld [vmem:[%s1608_s1 + $0x370] sm:$0xff] }
  0x1d   :  { %240 = vmatpush.msra.mxu3 %v971_v52  ;;  %199 = vmatpush.msra.mxu1 %v983_v54  ;;  %1696 = vst [vmem:[#allocation22_spill] sm:$0xff] %v1055_v51  ;;  %v1086_v52 = vld [vmem:[%s1608_s1 + $0x368] sm:$0xff] }
  0x1e   :  { %180 = vmatpush.msra.mxu0 %v978_v53  ;;  %221 = vmatpush.msra.mxu2 %v990_v55  ;;  %v1043_v55 = vld [vmem:[%s1608_s1 + $0x88] sm:$0xff]  ;;  %1701 = vst [vmem:[#allocation27_spill] sm:$0xff] %v1086_v52 }
  0x1f   :  { %241 = vmatpush.msra.mxu3 %v995_v56  ;;  %200 = vmatpush.msra.mxu1 %v1007_v58  ;;  %1695 = vst [vmem:[#allocation21_spill] sm:$0xff] %v1043_v55  ;;  %v1050_v56 = vld [vmem:[%s1608_s1 + $0x278] sm:$0xff]  ;;  %v1122_v58 = vld [vmem:[%s1608_s1 + $0x260] sm:$0xff] }
  0x20   :  { %181 = vmatpush.msra.mxu0 %v1002_v57  ;;  %222 = vmatpush.msra.mxu2 %v1014_v59  ;;  %v1062_v59 = vld [vmem:[%s1608_s1 + $0x3d8] sm:$0xff]  ;;  %1703 = vst [vmem:[#allocation29_spill] sm:$0xff] %v1098_v47 }
  0x21   :  { %242 = vmatpush.msra.mxu3 %v1019_v60  ;;  %1697 = vst [vmem:[#allocation23_spill] sm:$0xff] %v1062_v59  ;;  %v1067_v60 = vld [vmem:[%s1608_s1 + $0x80] sm:$0xff]  ;;  %201 = vmatpush.msra.mxu1 %v1043_v55  ;;  %v1091_v55 = vld [vmem:[%s1608_s1 + $0x3d0] sm:$0xff] }
  0x22   :  { %287 = vmatpush.msrb.mxu2 %v1026_v61  ;;  %1698 = vst [vmem:[#allocation24_spill] sm:$0xff] %v1067_v60  ;;  %182 = vmatpush.msra.mxu0 %v1038_v63  ;;  %v1074_v61 = vld [vmem:[%s1608_s1 + $0x270] sm:$0xff] }
  0x23   :  { %310 = vmatpush.msrb.mxu3 %v1031_v62  ;;  %1699 = vst [vmem:[#allocation25_spill] sm:$0xff] %v1074_v61  ;;  %v1079_v62 = vld [vmem:[%s1608_s1 + $0x2f8] sm:$0xff]  ;;  %202 = vmatpush.msra.mxu1 %v1067_v60  ;;  %v1115_v60 = vld [vmem:[%s1608_s1 + $0x3c8] sm:$0xff] }
  0x24   :  { %1700 = vst [vmem:[#allocation26_spill] sm:$0xff] %v1079_v62  ;;  %247 = vmatpush.msrb.mxu0 %v1050_v56  ;;  %288 = vmatpush.msrb.mxu2 %v1055_v51  ;;  %v1103_v51 = vld [vmem:[%s1608_s1 + $0x2f0] sm:$0xff] }
  0x25   :  { %1702 = vst [vmem:[#allocation28_spill] sm:$0xff] %v1091_v55  ;;  %311 = vmatpush.msrb.mxu3 %v1062_v59  ;;  %267 = vmatpush.msrb.mxu1 %v1079_v62  ;;  %v1110_v59 = vld [vmem:[%s1608_s1 + $0x360] sm:$0xff]  ;;  %v1127_v62 = vld [vmem:[%s1608_s1 + $0x2e8] sm:$0xff] }
  0x26   :  { %1704 = vst [vmem:[#allocation30_spill] sm:$0xff] %v1103_v51  ;;  %248 = vmatpush.msrb.mxu0 %v1074_v61  ;;  %289 = vmatpush.msrb.mxu2 %v1086_v52  ;;  %v1134_v52 = vld [vmem:[%s1608_s1 + $0x358] sm:$0xff] }
  0x27   :  { %1705 = vst [vmem:[#allocation31_spill] sm:$0xff] %v1110_v59  ;;  %312 = vmatpush.msrb.mxu3 %v1091_v55  ;;  %268 = vmatpush.msrb.mxu1 %v1103_v51  ;;  %v1139_v55 = vld [vmem:[%s1608_s1 + $0x3c0] sm:$0xff] }
  0x28   :  { %1706 = vst [vmem:[#allocation32_spill] sm:$0xff] %v1115_v60  ;;  %249 = vmatpush.msrb.mxu0 %v1098_v47  ;;  %290 = vmatpush.msrb.mxu2 %v1110_v59  ;;  %v1146_v47 = vld [vmem:[%s1608_s1 + $0x258] sm:$0xff]  ;;  %v1151_v51 = vld [vmem:[%s1608_s1 + $0x2e0] sm:$0xff]  ;;  %v1158_v59 = vld [vmem:[%s1608_s1 + $0x350] sm:$0xff] }
  0x29   :  { %1707 = vst [vmem:[#allocation33_spill] sm:$0xff] %v1122_v58  ;;  %313 = vmatpush.msrb.mxu3 %v1115_v60  ;;  %269 = vmatpush.msrb.mxu1 %v1127_v62  ;;  %v1163_v60 = vld [vmem:[%s1608_s1 + $0x3b8] sm:$0xff] }
  0x2a   :  { %1708 = vst [vmem:[#allocation34_spill] sm:$0xff] %v1127_v62  ;;  %250 = vmatpush.msrb.mxu0 %v1122_v58  ;;  %291 = vmatpush.msrb.mxu2 %v1134_v52  ;;  %v1170_v58 = vld [vmem:[%s1608_s1 + $0x250] sm:$0xff]  ;;  %v1175_v62 = vld [vmem:[%s1608_s1 + $0x2d8] sm:$0xff] }
  0x2b   :  { %1709 = vst [vmem:[#allocation35_spill] sm:$0xff] %v1134_v52  ;;  %314 = vmatpush.msrb.mxu3 %v1139_v55  ;;  %270 = vmatpush.msrb.mxu1 %v1151_v51  ;;  %v1182_v52 = vld [vmem:[%s1608_s1 + $0x348] sm:$0xff] }
  0x2c   :  { %1710 = vst [vmem:[#allocation36_spill] sm:$0xff] %v1139_v55  ;;  %251 = vmatpush.msrb.mxu0 %v1146_v47  ;;  %v1187_v55 = vld [vmem:[%s1608_s1 + $0x3b0] sm:$0xff]  ;;  %292 = vmatpush.msrb.mxu2 %v1158_v59 }
  0x2d   :  { %1711 = vst [vmem:[#allocation37_spill] sm:$0xff] %v1146_v47  ;;  %315 = vmatpush.msrb.mxu3 %v1163_v60  ;;  %v1194_v47 = vld [vmem:[%s1608_s1 + $0x248] sm:$0xff]  ;;  %271 = vmatpush.msrb.mxu1 %v1175_v62 }
  0x2e   :  { %1712 = vst [vmem:[#allocation38_spill] sm:$0xff] %v1151_v51  ;;  %v1199_v51 = vld [vmem:[%s1608_s1 + $0x2d0] sm:$0xff]  ;;  %252 = vmatpush.msrb.mxu0 %v1170_v58  ;;  %293 = vmatpush.msrb.mxu2 %v1182_v52 }
  0x2f   :  { %1713 = vst [vmem:[#allocation39_spill] sm:$0xff] %v1158_v59  ;;  %v1206_v59 = vld [vmem:[%s1608_s1 + $0x340] sm:$0xff]  ;;  %316 = vmatpush.msrb.mxu3 %v1187_v55 }
  0x30   :  { %1714 = vst [vmem:[#allocation40_spill] sm:$0xff] %v1163_v60  ;;  %v1211_v60 = vld [vmem:[%s1608_s1 + $0x3a8] sm:$0xff] }
  0x31   :  { %1715 = vst [vmem:[#allocation41_spill] sm:$0xff] %v1170_v58  ;;  %v1218_v58 = vld [vmem:[%s1608_s1 + $0x240] sm:$0xff] }
  0x32   :  { %1716 = vst [vmem:[#allocation42_spill] sm:$0xff] %v1175_v62  ;;  %v1223_v62 = vld [vmem:[%s1608_s1 + $0x2c8] sm:$0xff] }
  0x33   :  { %1717 = vst [vmem:[#allocation43_spill] sm:$0xff] %v1182_v52 }
  0x34   :  { %1718 = vst [vmem:[#allocation44_spill] sm:$0xff] %v1187_v55 }
  0x35   :  { %1719 = vst [vmem:[#allocation45_spill] sm:$0xff] %v1194_v47 }
  0x36   :  { %1720 = vst [vmem:[#allocation46_spill] sm:$0xff] %v1199_v51 }
  0x37   :  { %1721 = vst [vmem:[#allocation47_spill] sm:$0xff] %v1206_v59 }
  0x38   :  { %1722 = vst [vmem:[#allocation48_spill] sm:$0xff] %v1211_v60 }
  0x39   :  { %1723 = vst [vmem:[#allocation49_spill] sm:$0xff] %v1218_v58 }
  0x3a   :  { %1724 = vst [vmem:[#allocation50_spill] sm:$0xff] %v1223_v62 }
  0x3b   :  { %11 = vsyncpa [#allocation5], 0  ;;  %253 = vmatpush.msrb.mxu0 %v1194_v47  ;;  %272 = vmatpush.msrb.mxu1 %v1199_v51  ;;  %v1230_v52 = vld [vmem:[%s1608_s1 + $0x338] sm:$0xff]  ;;  %v1235_v55 = vld [vmem:[%s1608_s1 + $0x3a0] sm:$0xff]  ;;  %vm163_vm0 = vcmask 850944   ;;  %vm509_vm3 = vcmask 818176  }
  0x3c   :  { %1725 = vst [vmem:[#allocation51_spill] sm:$0xff] %v1230_v52  ;;  %294 = vmatpush.msrb.mxu2 %v1206_v59  ;;  %317 = vmatpush.msrb.mxu3 %v1211_v60  ;;  %v1242_v47 = vld [vmem:[%s1608_s1 + $0x238] sm:$0xff]  ;;  %v1247_v51 = vld [vmem:[%s1608_s1 + $0x2c0] sm:$0xff]  ;;  %v1254_v59 = vld [vmem:[%s1608_s1 + $0x330] sm:$0xff]  ;;  %s543_s22 = sshll.u32 %s1610_s3, 4  ;;  %s634_s23 = smov [#allocation2]   ;;  %s544_s22 = int_to_ptr.hbm [resolvable:$true] %s543_s22 }
  0x3d   :  { %1726 = vst [vmem:[#allocation52_spill] sm:$0xff] %v1235_v55  ;;  %254 = vmatpush.msrb.mxu0 %v1218_v58  ;;  %273 = vmatpush.msrb.mxu1 %v1223_v62  ;;  %v1259_v60 = vld [vmem:[%s1608_s1 + $0x398] sm:$0xff]  ;;  %v1266_v58 = vld [vmem:[%s1608_s1 + $0x230] sm:$0xff]  ;;  %v1305_v61 = vld [vmem:[%s1607_s0] sm:$0xff]  ;;  %s541_s24 = sshll.u32 %s634_s23, 4  ;;  %s635_s25 = smov [#allocation4]   ;;  %s542_s24 = int_to_ptr.vmem [resolvable:$true] %s541_s24 }
  0x3e   :  { %1727 = vst [vmem:[#allocation53_spill] sm:$0xff] %v1242_v47  ;;  %295 = vmatpush.msrb.mxu2 %v1230_v52  ;;  %318 = vmatpush.msrb.mxu3 %v1235_v55  ;;  %v1271_v62 = vld [vmem:[%s1608_s1 + $0x2b8] sm:$0xff]  ;;  %v1276_v48 = vld [vmem:[%s1607_s0 + $0x10] sm:$0xff]  ;;  %v1283_v55 = vld [vmem:[%s1608_s1 + $0x328] sm:$0xff]  ;;  %s552_s3 = sshll.u32 %s635_s25, 4  ;;  %s554_s28 = sshll.u32 %s1611_s4, 4  ;;  %s553_s3 = int_to_ptr.vmem [resolvable:$true] %s552_s3  ;;  %s555_s28 = int_to_ptr.hbm [resolvable:$true] %s554_s28 }
  0x3f   :  { %1728 = vst [vmem:[#allocation54_spill] sm:$0xff] %v1247_v51  ;;  %255 = vmatpush.msrb.mxu0 %v1242_v47  ;;  %274 = vmatpush.msrb.mxu1 %v1247_v51  ;;  %v1288_v52 = vld [vmem:[%s1608_s1 + $0x390] sm:$0xff]  ;;  %v1295_v47 = vld [vmem:[%s1608_s1 + $0x228] sm:$0xff]  ;;  %v154_v43 = vadd.f32 10.0, %v1276_v48  ;;  %v1323_v54 = vld [vmem:[%s1607_s0 + $0x18] sm:$0xff] }
  0x40   :  { %1729 = vst [vmem:[#allocation55_spill] sm:$0xff] %v1254_v59  ;;  %296 = vmatpush.msrb.mxu2 %v1254_v59  ;;  %319 = vmatpush.msrb.mxu3 %v1259_v60  ;;  %v1300_v51 = vld [vmem:[%s1608_s1 + $0x2b0] sm:$0xff]  ;;  %v1317_v59 = vld [vmem:[%s1608_s1 + $0x388] sm:$0xff] }
  0x41   :  { %1730 = vst [vmem:[#allocation56_spill] sm:$0xff] %v1259_v60  ;;  %256 = vmatpush.msrb.mxu0 %v1266_v58  ;;  %275 = vmatpush.msrb.mxu1 %v1271_v62  ;;  %v1312_v60 = vld [vmem:[%s1608_s1 + $0x320] sm:$0xff] }
  0x42   :  { %1731 = vst [vmem:[#allocation57_spill] sm:$0xff] %v1266_v58  ;;  %297 = vmatpush.msrb.mxu2 %v1283_v55  ;;  %320 = vmatpush.msrb.mxu3 %v1288_v52  ;;  %v1348_v58 = vld [vmem:[%s1607_s0 + $0x8] sm:$0xff] }
  0x43   :  { %1732 = vst [vmem:[#allocation58_spill] sm:$0xff] %v1271_v62  ;;  %v1330_v62 = vld [vmem:[%s1608_s1 + $0x220] sm:$0xff]  ;;  %257 = vmatpush.msrb.mxu0 %v1295_v47  ;;  %276 = vmatpush.msrb.mxu1 %v1300_v51 }
  0x44   :  { %1733 = vst [vmem:[#allocation59_spill] sm:$0xff] %v1276_v48  ;;  %v1337_v48 = vld [vmem:[%s1608_s1 + $0x2a8] sm:$0xff]  ;;  %298 = vmatpush.msrb.mxu2 %v1312_v60  ;;  %321 = vmatpush.msrb.mxu3 %v1317_v59 }
  0x45   :  { %1734 = vst [vmem:[#allocation60_spill] sm:$0xff] %v1283_v55  ;;  %v1342_v55 = vld [vmem:[%s1608_s1 + $0x318] sm:$0xff]  ;;  %223 = vmatmul.f32.vlgmr.msra.gmra.mxu2 %v154_v43  ;;  %258 = vmatpush.msrb.mxu0 %v1330_v62  ;;  %v1376_v43 = vld [vmem:[%s1608_s1 + $0x310] sm:$0xff] }
  0x46   :  { %1735 = vst [vmem:[#allocation61_spill] sm:$0xff] %v1288_v52  ;;  %v152_v52 = vadd.f32 10.0, %v1305_v61  ;;  %277 = vmatpush.msrb.mxu1 %v1337_v48  ;;  %299 = vmatpush.msrb.mxu2 %v1342_v55 }
  0x47   :  { %1736 = vst [vmem:[#allocation62_spill] sm:$0xff] %v1295_v47  ;;  %v155_v47 = vadd.f32 10.0, %v1323_v54 }
  0x48   :  { %1737 = vst [vmem:[#allocation63_spill] sm:$0xff] %v1300_v51  ;;  %v1355_v51 = vld [vmem:[%s1608_s1 + $0x380] sm:$0xff]  ;;  %183 = vmatmul.f32.vlgmr.msra.gmra.mxu0 %v152_v52  ;;  %v1399_v52 = vld [vmem:[%s1608_s1 + $0x308] sm:$0xff]  ;;  %300 = vmatpush.msrb.mxu2 %v1376_v43 }
  0x49   :  { %1738 = vst [vmem:[#allocation64_spill] sm:$0xff] %v1305_v61  ;;  %v1362_v61 = vld [vmem:[%s1608_s1 + $0x218] sm:$0xff]  ;;  %322 = vmatpush.msrb.mxu3 %v1355_v51 }
  0x4a   :  { %1739 = vst [vmem:[#allocation65_spill] sm:$0xff] %v1312_v60  ;;  %v153_v60 = vadd.f32 10.0, %v1348_v58  ;;  %243 = vmatmul.f32.vlgmr.msra.gmra.mxu3 %v155_v47  ;;  %259 = vmatpush.msrb.mxu0 %v1362_v61  ;;  %v1394_v47 = vld [vmem:[%s1608_s1 + $0x298] sm:$0xff] }
  0x4b   :  { %1740 = vst [vmem:[#allocation66_spill] sm:$0xff] %v1317_v59  ;;  %v1369_v59 = vld [vmem:[%s1608_s1 + $0x2a0] sm:$0xff]  ;;  %330 = vmatpush.msra.mxu3 %v674_v2  ;;  %301 = vmatpush.msrb.mxu2 %v1399_v52 }
  0x4c   :  { %1741 = vst [vmem:[#allocation67_spill] sm:$0xff] %v1323_v54  ;;  %278 = vmatpush.msrb.mxu1 %v1369_v59  ;;  %v1410_v2 = vld [vmem:[%s1607_s0 + $0x20] sm:$0xff] }
  0x4d   :  { %1742 = vst [vmem:[#allocation68_spill] sm:$0xff] %v1337_v48  ;;  %203 = vmatmul.f32.vlgmr.msra.gmra.mxu1 %v153_v60  ;;  %331 = vmatpush.msra.mxu3 %v691_v5  ;;  %v1422_v60 = vld [vmem:[%s1608_s1 + $0x290] sm:$0xff]  ;;  %v1437_v5 = vld [vmem:[%s1608_s1 + $0x200] sm:$0xff]  ;;  %v1442_v48 = vld [vmem:[%s1608_s1 + $0x288] sm:$0xff] }
  0x4e   :  { %1743 = vst [vmem:[#allocation69_spill] sm:$0xff] %v1342_v55  ;;  %v1382_v55 = vld [vmem:[%s1608_s1 + $0x210] sm:$0xff]  ;;  %279 = vmatpush.msrb.mxu1 %v1394_v47 }
  0x4f   :  { %1744 = vst [vmem:[#allocation70_spill] sm:$0xff] %v1348_v58  ;;  %v1387_v58 = vld [vmem:[%s1607_s0 + $0x30] sm:$0xff]  ;;  %260 = vmatpush.msrb.mxu0 %v1382_v55  ;;  %332 = vmatpush.msra.mxu3 %v714_v9  ;;  %v1449_v9 = vld [vmem:[%s1607_s0 + $0x28] sm:$0xff] }
  0x50   :  { %1745 = vst [vmem:[#allocation71_spill] sm:$0xff] %v1355_v51  ;;  %v1405_v51 = vld [vmem:[%s1608_s1 + $0x208] sm:$0xff]  ;;  %v158_v54 = vadd.f32 10.0, %v1387_v58  ;;  %280 = vmatpush.msrb.mxu1 %v1422_v60 }
  0x51   :  { %1746 = vst [vmem:[#allocation72_spill] sm:$0xff] %v1369_v59  ;;  %v1415_v59 = vld [vmem:[%s1607_s0 + $0x38] sm:$0xff]  ;;  %261 = vmatpush.msrb.mxu0 %v1405_v51  ;;  %333 = vmatpush.msra.mxu3 %v738_v13 }
  0x52   :  { %1747 = vst [vmem:[#allocation73_spill] sm:$0xff] %v1376_v43  ;;  %v1427_v43 = vld [vmem:[%s1608_s1 + $0x300] sm:$0xff]  ;;  %281 = vmatpush.msrb.mxu1 %v1442_v48  ;;  %v1762_v13 = vld [vmem:[#allocation33_spill] sm:$0xff] }
  0x53   :  { %1748 = vst [vmem:[#allocation74_spill] sm:$0xff] %v1387_v58  ;;  %v156_v58 = vadd.f32 10.0, %v1410_v2  ;;  %302 = vmatpush.msrb.mxu2 %v1427_v43  ;;  %262 = vmatpush.msrb.mxu0 %v1437_v5 }
  0x54   :  { %1749 = vst [vmem:[#allocation75_spill] sm:$0xff] %v1394_v47  ;;  %v159_v47 = vadd.f32 10.0, %v1415_v59  ;;  %303 = vmatmul.f32.vlgmr.msrb.gmra.mxu2 %v158_v54  ;;  %334 = vmatpush.msra.mxu3 %v762_v17  ;;  %v1766_v17 = vld [vmem:[#allocation37_spill] sm:$0xff]  ;;  %v1798_v54 = vld [vmem:[#allocation47_spill] sm:$0xff] }
  0x55   :  { %1750 = vst [vmem:[#allocation76_spill] sm:$0xff] %v1399_v52  ;;  %v1459_v52 = vld [vmem:[%s1608_s1 + $0x280] sm:$0xff]  ;;  %263 = vmatmul.f32.vlgmr.msrb.gmra.mxu0 %v156_v58  ;;  %390 = vmatpush.msra.mxu2 %v669_v1  ;;  %v1753_v1 = vld [vmem:[#allocation8_spill] sm:$0xff]  ;;  %v1801_v58 = vld [vmem:[#allocation51_spill] sm:$0xff] }
  0x56   :  { %1751 = vst [vmem:[#allocation77_spill] sm:$0xff] %v1415_v59  ;;  %v157_v59 = vadd.f32 10.0, %v1449_v9  ;;  %568 = vmatmul.msk.f32.vlgmr.msrb.gmra.mxu3 %vm163_vm0, %v159_v47  ;;  %350 = vmatpush.msra.mxu0 %v697_v6  ;;  %v1756_v6 = vld [vmem:[#allocation16_spill] sm:$0xff]  ;;  %v1806_v47 = vld [vmem:[#allocation67_spill] sm:$0xff] }
  0x57   :  { %282 = vmatpush.msrb.mxu1 %v1459_v52  ;;  %335 = vmatpush.msra.mxu3 %v786_v21  ;;  %v1770_v21 = vld [vmem:[#allocation41_spill] sm:$0xff] }
  0x58   :  { %283 = vmatmul.f32.vlgmr.msrb.gmra.mxu1 %v157_v59  ;;  %351 = vmatpush.msra.mxu0 %v719_v10  ;;  %v1759_v10 = vld [vmem:[#allocation12_spill] sm:$0xff] }
  0x59   :  { %370 = vmatpush.msra.mxu1 %v664_v0  ;;  %336 = vmatpush.msra.mxu3 %v810_v25  ;;  %v1752_v0 = vld [vmem:[#allocation13_spill] sm:$0xff]  ;;  %v1802_v59 = vld [vmem:[#allocation48_spill] sm:$0xff] }
  0x5a   :  { %391 = vmatpush.msra.mxu2 %v686_v4  ;;  %352 = vmatpush.msra.mxu0 %v743_v14  ;;  %v1755_v4 = vld [vmem:[#allocation10_spill] sm:$0xff]  ;;  %v1763_v14 = vld [vmem:[#allocation15_spill] sm:$0xff]  ;;  %v1774_v25 = vld [vmem:[#allocation45_spill] sm:$0xff] }
  0x5b   :  { %371 = vmatpush.msra.mxu1 %v681_v3  ;;  %337 = vmatpush.msra.mxu3 %v834_v29  ;;  %v1754_v3 = vld [vmem:[#allocation25_spill] sm:$0xff] }
  0x5c   :  { %392 = vmatpush.msra.mxu2 %v707_v8  ;;  %353 = vmatpush.msra.mxu0 %v767_v18  ;;  %v1758_v8 = vld [vmem:[#allocation29_spill] sm:$0xff]  ;;  %v1767_v18 = vld [vmem:[#allocation26_spill] sm:$0xff] }
  0x5d   :  { %372 = vmatpush.msra.mxu1 %v702_v7  ;;  %338 = vmatpush.msra.mxu3 %v858_v33  ;;  %v1757_v7 = vld [vmem:[#allocation9_spill] sm:$0xff] }
  0x5e   :  { %393 = vmatpush.msra.mxu2 %v731_v12  ;;  %354 = vmatpush.msra.mxu0 %v791_v22  ;;  %v1761_v12 = vld [vmem:[#allocation11_spill] sm:$0xff]  ;;  %v1771_v22 = vld [vmem:[#allocation30_spill] sm:$0xff]  ;;  %v1778_v29 = vld [vmem:[#allocation49_spill] sm:$0xff] }
  0x5f   :  { %373 = vmatpush.msra.mxu1 %v726_v11  ;;  %339 = vmatpush.msra.mxu3 %v882_v37  ;;  %v1760_v11 = vld [vmem:[#allocation21_spill] sm:$0xff] }
  0x60   :  { %394 = vmatpush.msra.mxu2 %v755_v16  ;;  %355 = vmatpush.msra.mxu0 %v815_v26  ;;  %v1765_v16 = vld [vmem:[#allocation14_spill] sm:$0xff]  ;;  %v1782_v33 = vld [vmem:[#allocation53_spill] sm:$0xff] }
  0x61   :  { %374 = vmatpush.msra.mxu1 %v750_v15  ;;  %340 = vmatpush.msra.mxu3 %v906_v41  ;;  %v1764_v15 = vld [vmem:[#allocation24_spill] sm:$0xff]  ;;  %v1775_v26 = vld [vmem:[#allocation34_spill] sm:$0xff]  ;;  %v1786_v37 = vld [vmem:[#allocation57_spill] sm:$0xff] }
  0x62   :  { %395 = vmatpush.msra.mxu2 %v779_v20  ;;  %356 = vmatpush.msra.mxu0 %v839_v30  ;;  %v1769_v20 = vld [vmem:[#allocation18_spill] sm:$0xff] }
  0x63   :  { %375 = vmatpush.msra.mxu1 %v774_v19  ;;  %341 = vmatpush.msra.mxu3 %v930_v45  ;;  %v1768_v19 = vld [vmem:[#allocation17_spill] sm:$0xff]  ;;  %v1779_v30 = vld [vmem:[#allocation38_spill] sm:$0xff]  ;;  %v1793_v45 = vld [vmem:[#allocation40_spill] sm:$0xff] }
  0x64   :  { %396 = vmatpush.msra.mxu2 %v803_v24  ;;  %357 = vmatpush.msra.mxu0 %v863_v34  ;;  %v1773_v24 = vld [vmem:[#allocation20_spill] sm:$0xff]  ;;  %v1783_v34 = vld [vmem:[#allocation42_spill] sm:$0xff] }
  0x65   :  { %376 = vmatpush.msra.mxu1 %v798_v23  ;;  %342 = vmatpush.msra.mxu3 %v954_v49  ;;  %v1772_v23 = vld [vmem:[#allocation19_spill] sm:$0xff]  ;;  %v1790_v41 = vld [vmem:[#allocation62_spill] sm:$0xff] }
  0x66   :  { %397 = vmatpush.msra.mxu2 %v827_v28  ;;  %358 = vmatpush.msra.mxu0 %v887_v38  ;;  %v1777_v28 = vld [vmem:[#allocation23_spill] sm:$0xff]  ;;  %v1787_v38 = vld [vmem:[#allocation46_spill] sm:$0xff] }
  0x67   :  { %377 = vmatpush.msra.mxu1 %v822_v27  ;;  %343 = vmatpush.msra.mxu3 %v978_v53  ;;  %v1776_v27 = vld [vmem:[#allocation22_spill] sm:$0xff]  ;;  %v1795_v49 = vld [vmem:[#allocation43_spill] sm:$0xff] }
  0x68   :  { %398 = vmatpush.msra.mxu2 %v851_v32  ;;  %359 = vmatpush.msra.mxu0 %v911_v42  ;;  %v1781_v32 = vld [vmem:[#allocation28_spill] sm:$0xff]  ;;  %v1791_v42 = vld [vmem:[#allocation50_spill] sm:$0xff] }
  0x69   :  { %378 = vmatpush.msra.mxu1 %v846_v31  ;;  %344 = vmatpush.msra.mxu3 %v1002_v57  ;;  %v1780_v31 = vld [vmem:[#allocation27_spill] sm:$0xff]  ;;  %v1797_v53 = vld [vmem:[#allocation58_spill] sm:$0xff] }
  0x6a   :  { %399 = vmatpush.msra.mxu2 %v875_v36  ;;  %360 = vmatpush.msra.mxu0 %v935_v46  ;;  %v1785_v36 = vld [vmem:[#allocation32_spill] sm:$0xff]  ;;  %v1794_v46 = vld [vmem:[#allocation54_spill] sm:$0xff]  ;;  %v1800_v57 = vld [vmem:[#allocation63_spill] sm:$0xff] }
  0x6b   :  { %379 = vmatpush.msra.mxu1 %v870_v35  ;;  %345 = vmatpush.msra.mxu3 %v1038_v63  ;;  %v1784_v35 = vld [vmem:[#allocation31_spill] sm:$0xff] }
  0x6c   :  { %400 = vmatpush.msra.mxu2 %v899_v40  ;;  %361 = vmatpush.msra.mxu0 %v959_v50  ;;  %v1789_v40 = vld [vmem:[#allocation36_spill] sm:$0xff]  ;;  %v1804_v63 = vld [vmem:[#allocation55_spill] sm:$0xff] }
  0x6d   :  { %380 = vmatpush.msra.mxu1 %v894_v39  ;;  %410 = vmatpush.msrb.mxu3 %v1050_v56  ;;  %v1788_v39 = vld [vmem:[#allocation35_spill] sm:$0xff]  ;;  %v1796_v50 = vld [vmem:[#allocation64_spill] sm:$0xff] }
  0x6e   :  { %401 = vmatpush.msra.mxu2 %v923_v44  ;;  %362 = vmatpush.msra.mxu0 %v1752_v0  ;;  %v1792_v44 = vld [vmem:[#allocation39_spill] sm:$0xff]  ;;  %v1799_v56 = vld [vmem:[#allocation44_spill] sm:$0xff] }
  0x6f   :  { %381 = vmatpush.msra.mxu1 %v1753_v1  ;;  %411 = vmatpush.msrb.mxu3 %v1754_v3  ;;  %v1807_v0 = vld [vmem:[#allocation72_spill] sm:$0xff]  ;;  %v1810_v3 = vld [vmem:[#allocation70_spill] sm:$0xff] }
  0x70   :  { %402 = vmatpush.msra.mxu2 %v1755_v4  ;;  %363 = vmatpush.msra.mxu0 %v1756_v6  ;;  %v1809_v1 = vld [vmem:[#allocation56_spill] sm:$0xff]  ;;  %v1812_v4 = vld [vmem:[#allocation65_spill] sm:$0xff] }
  0x71   :  { %382 = vmatpush.msra.mxu1 %v1757_v7  ;;  %412 = vmatpush.msrb.mxu3 %v1758_v8  ;;  %v1813_v6 = vld [vmem:[#allocation61_spill] sm:$0xff]  ;;  %v1814_v7 = vld [vmem:[#allocation59_spill] sm:$0xff]  ;;  %v1816_v8 = vld [vmem:[#allocation66_spill] sm:$0xff] }
  0x72   :  { %403 = vmatpush.msra.mxu2 %v1759_v10  ;;  %364 = vmatpush.msra.mxu0 %v1760_v11  ;;  %v1817_v10 = vld [vmem:[#allocation73_spill] sm:$0xff]  ;;  %v1818_v11 = vld [vmem:[#allocation71_spill] sm:$0xff] }
  0x73   :  { %383 = vmatpush.msra.mxu1 %v1761_v12  ;;  %413 = vmatpush.msrb.mxu3 %v1762_v13  ;;  %v1820_v12 = vld [vmem:[#allocation76_spill] sm:$0xff] }
  0x74   :  { %404 = vmatpush.msra.mxu2 %v1763_v14  ;;  %365 = vmatpush.msra.mxu0 %v1764_v15 }
  0x75   :  { %384 = vmatpush.msra.mxu1 %v1765_v16  ;;  %414 = vmatpush.msrb.mxu3 %v1766_v17 }
  0x76   :  { %430 = vmatpush.msrb.mxu0 %v1767_v18  ;;  %405 = vmatpush.msra.mxu2 %v1769_v20 }
  0x77   :  { %385 = vmatpush.msra.mxu1 %v1768_v19  ;;  %415 = vmatpush.msrb.mxu3 %v1770_v21 }
  0x78   :  { %431 = vmatpush.msrb.mxu0 %v1771_v22  ;;  %473 = vmatpush.msrb.mxu2 %v1773_v24 }
  0x79   :  { %450 = vmatpush.msrb.mxu1 %v1772_v23  ;;  %416 = vmatpush.msrb.mxu3 %v1774_v25 }
  0x7a   :  { %432 = vmatpush.msrb.mxu0 %v1775_v26  ;;  %474 = vmatpush.msrb.mxu2 %v1777_v28 }
  0x7b   :  { %451 = vmatpush.msrb.mxu1 %v1776_v27  ;;  %417 = vmatpush.msrb.mxu3 %v1778_v29 }
  0x7c   :  { %433 = vmatpush.msrb.mxu0 %v1779_v30  ;;  %475 = vmatpush.msrb.mxu2 %v1781_v32 }
  0x7d   :  { %452 = vmatpush.msrb.mxu1 %v1780_v31  ;;  %418 = vmatpush.msrb.mxu3 %v1782_v33 }
  0x7e   :  { %434 = vmatpush.msrb.mxu0 %v1783_v34  ;;  %476 = vmatpush.msrb.mxu2 %v1785_v36 }
  0x7f   :  { %453 = vmatpush.msrb.mxu1 %v1784_v35  ;;  %419 = vmatpush.msrb.mxu3 %v1786_v37 }
  0x80   :  { %435 = vmatpush.msrb.mxu0 %v1787_v38  ;;  %477 = vmatpush.msrb.mxu2 %v1789_v40 }
  0x81   :  { %454 = vmatpush.msrb.mxu1 %v1788_v39  ;;  %420 = vmatpush.msrb.mxu3 %v1790_v41 }
  0x82   :  { %436 = vmatpush.msrb.mxu0 %v1791_v42  ;;  %478 = vmatpush.msrb.mxu2 %v1793_v45 }
  0x83   :  { %455 = vmatpush.msrb.mxu1 %v1792_v44  ;;  %421 = vmatpush.msrb.mxu3 %v1330_v62  ;;  %v1803_v62 = vld [vmem:[#allocation68_spill] sm:$0xff] }
  0x84   :  { %437 = vmatpush.msrb.mxu0 %v1794_v46  ;;  %346 = vmatmul.f32.vlgmr.msra.gmra.mxu3 %v1796_v50 }
  0x85   :  { %456 = vmatpush.msrb.mxu1 %v1795_v49  ;;  %422 = vmatpush.msrb.mxu3 %v1362_v61  ;;  %v1805_v61 = vld [vmem:[#allocation52_spill] sm:$0xff] }
  0x86   :  { %438 = vmatpush.msrb.mxu0 %v1797_v53  ;;  %479 = vmatpush.msrb.mxu2 %v1799_v56 }
  0x87   :  { %457 = vmatpush.msrb.mxu1 %v1798_v54  ;;  %423 = vmatpush.msrb.mxu3 %v1382_v55  ;;  %v1808_v55 = vld [vmem:[#allocation60_spill] sm:$0xff] }
  0x88   :  { %439 = vmatpush.msrb.mxu0 %v1800_v57  ;;  %480 = vmatpush.msrb.mxu2 %v1802_v59 }
  0x89   :  { %458 = vmatpush.msrb.mxu1 %v1801_v58  ;;  %424 = vmatpush.msrb.mxu3 %v1405_v51  ;;  %v1811_v51 = vld [vmem:[#allocation75_spill] sm:$0xff] }
  0x8a   :  { %440 = vmatpush.msrb.mxu0 %v1803_v62  ;;  %481 = vmatpush.msrb.mxu2 %v1805_v61 }
  0x8b   :  { %459 = vmatpush.msrb.mxu1 %v1804_v63  ;;  %406 = vmatmul.f32.vlgmr.msra.gmra.mxu2 %v1806_v47 }
  0x8c   :  { %425 = vmatpush.msrb.mxu3 %v1437_v5  ;;  %441 = vmatpush.msrb.mxu0 %v1807_v0  ;;  %v1815_v5 = vld [vmem:[#allocation69_spill] sm:$0xff] }
  0x8d   :  { %460 = vmatpush.msrb.mxu1 %v1808_v55  ;;  %482 = vmatpush.msrb.mxu2 %v1809_v1 }
  0x8e   :  { %366 = vmatmul.f32.vlgmr.msra.gmra.mxu0 %v1810_v3  ;;  %426 = vmatmul.f32.vlgmr.msrb.gmra.mxu3 %v1410_v2  ;;  %v1819_v2 = vld [vmem:[#allocation77_spill] sm:$0xff] }
  0x8f   :  { %442 = vmatpush.msrb.mxu0 %v1811_v51  ;;  %461 = vmatpush.msrb.mxu1 %v1812_v4 }
  0x90   :  { %483 = vmatpush.msrb.mxu2 %v1813_v6  ;;  %386 = vmatmul.f32.vlgmr.msra.gmra.mxu1 %v1814_v7 }
  0x91   :  { %443 = vmatpush.msrb.mxu0 %v1422_v60  ;;  %462 = vmatpush.msrb.mxu1 %v1815_v5  ;;  %v1821_v60 = vld [vmem:[#allocation74_spill] sm:$0xff] }
  0x92   :  { %484 = vmatpush.msrb.mxu2 %v1816_v8 }
  0x93   :  { %444 = vmatpush.msrb.mxu0 %v1442_v48  ;;  %463 = vmatpush.msrb.mxu1 %v1817_v10  ;;  %v573_v48 = vld [vmem:[%s1609_s2] ss:$0 sm:$0xff] }
  0x94   :  { %485 = vmatpush.msrb.mxu2 %v1818_v11 }
  0x95   :  { %569 = vmatmul.msk.f32.vlgmr.msrb.gmra.mxu2 %vm163_vm0, %v1819_v2  ;;  %445 = vmatpush.msrb.mxu0 %v1459_v52 }
  0x96   :  { %464 = vmatpush.msrb.mxu1 %v1820_v12  ;;  %446 = vmatmul.f32.vlgmr.msrb.gmra.mxu0 %v1449_v9 }
  0x98   :  { %465 = vmatpush.msrb.mxu1 %v1427_v43 }
  0x99   :  { %466 = vmatmul.f32.vlgmr.msrb.gmra.mxu1 %v1821_v60 }
  0xc5   :  { %v184_v13 = vpop.f32.mrf.mxu0 }
  0xc6   :  { %v185_v14 = vadd.f32 %v573_v48, %v184_v13 }
  0xc8   :  { %v224_v17 = vpop.f32.mrf.mxu2 }
  0xca   :  { %v204_v15 = vpop.f32.mrf.mxu1 }
  0xcb   :  { %v205_v16 = vadd.f32 %v204_v15, %v185_v14 }
  0xcd   :  { %v225_v18 = vadd.f32 %v224_v17, %v205_v16  ;;  %v244_v19 = vpop.f32.mrf.mxu3 }
  0xcf   :  { %v245_v52 = vadd.f32 %v244_v19, %v225_v18 }
  0xd2   :  { %v264_v20 = vpop.f32.mrf.mxu0 }
  0xd3   :  { %v265_v21 = vadd.f32 %v264_v20, %v245_v52 }
  0xd5   :  { %v284_v22 = vpop.f32.mrf.mxu1 }
  0xd6   :  { %v285_v9 = vadd.f32 %v284_v22, %v265_v21 }
  0xd7   :  { %v304_v23 = vpop.f32.mrf.mxu2 }
  0xd8   :  { %v305_v43 = vadd.f32 %v304_v23, %v285_v9 }
  0xd9   :  { %v324_v24 = vpop.f32.mrf.mxu3 }
  0xda   :  { %v325_v25 = vadd.f32 %v324_v24, %v305_v43 }
  0xdc   :  { %v570_v26 = vmul.f32 -1.442695, %v325_v25 }
  0xde   :  { %574 = vpow2.f32 %v570_v26 }
  0xe4   :  { %v575_v27 = vpop.eup %574 }
  0xe5   :  { %v493_v28 = vadd.f32 1.0, %v575_v27 }
  0xe7   :  { %576 = vrcp.f32 %v493_v28  ;;  %v505_v32 = vand.u32 2147483648, %v493_v28  ;;  %v503_v34 = vand.u32 2147483647, %v493_v28  ;;  %vm499_vm2 = vweird.f32 %v493_v28 }
  0xe9   :  { %v506_v36 = vor.u32 1.1754944e-38, %v505_v32  ;;  %vm504_vm5 = vcmp.eq.f32.partialorder %v503_v34, 8.507059e+37 }
  0xed   :  { %v577_v29 = vpop.eup %576 }
  0xee   :  { %v495_v30 = vmul.f32 %v577_v29, %v493_v28  ;;  %vm500_vm1 = vweird.f32 %v577_v29 }
  0xef   :  { %vm501_vm4 = vmor %vm499_vm2, %vm500_vm1 }
  0xf0   :  { %v496_v31 = vsub.f32 1.0, %v495_v30 }
  0xf2   :  { %v497_v33 = vmul.f32 %v577_v29, %v496_v31 }
  0xf4   :  { %v498_v35 = vadd.f32 %v577_v29, %v497_v33 }
  0xf6   :  { %v502_v37 = vsel %vm501_vm4, %v577_v29, %v498_v35 }
  0xf7   :  { %v507_v38 = vsel %vm504_vm5, %v506_v36, %v502_v37 }
  0xf8   :  { %510 = vst.msk [vmem:[#allocation2] sm:$0xff] %vm509_vm3, %v507_v38 }
  0xf9   :  { %546 = dma.vmem_to_hbm [thread:$0]  %s542_s24, 128, %s544_s22, [#allocation3]  }
 0x107   :  { %v347_v39 = vpop.f32.mrf.mxu3 }
 0x108   :  { %v348_v40 = vadd.f32 %v573_v48, %v347_v39 }
 0x10b   :  { %v367_v41 = vpop.f32.mrf.mxu0 }
 0x10c   :  { %v368_v42 = vadd.f32 %v367_v41, %v348_v40 }
 0x10d   :  { %v387_v44 = vpop.f32.mrf.mxu1 }
 0x10e   :  { %v388_v45 = vadd.f32 %v387_v44, %v368_v42  ;;  %v407_v46 = vpop.f32.mrf.mxu2 }
 0x110   :  { %v408_v49 = vadd.f32 %v407_v46, %v388_v45 }
 0x111   :  { %v427_v50 = vpop.f32.mrf.mxu3 }
 0x112   :  { %v428_v53 = vadd.f32 %v427_v50, %v408_v49 }
 0x113   :  { %v447_v54 = vpop.f32.mrf.mxu0 }
 0x114   :  { %v448_v56 = vadd.f32 %v447_v54, %v428_v53 }
 0x116   :  { %v467_v57 = vpop.f32.mrf.mxu1 }
 0x117   :  { %v468_v58 = vadd.f32 %v467_v57, %v448_v56 }
 0x118   :  { %v487_v59 = vpop.f32.mrf.mxu2 }
 0x119   :  { %v488_v62 = vadd.f32 %v487_v59, %v468_v58 }
 0x11b   :  { %v511_v63 = vsel %vm509_vm3, %v488_v62, -inf }
 0x11c   :  { %512 = vmax.xlane.f32.xlu0 %v511_v63 }
 0x18f   :  { %v513_v61 = vpop.xlane.xlu0 %512 }
 0x190   :  { %v514_v47 = vsub.f32 %v488_v62, %v513_v61 }
 0x192   :  { %v515_v0 = vmul.f32 1.442695, %v514_v47 }
 0x194   :  { %578 = vpow2.f32 %v515_v0 }
 0x19a   :  { %v579_v55 = vpop.eup %578 }
 0x19b   :  { %v517_v1 = vsel %vm509_vm3, %v579_v55, 0.0 }
 0x19c   :  { %518 = vadd.xlane.f32.xlu0 %v517_v1 }
 0x20f   :  { %v519_v3 = vpop.xlane.xlu0 %518 }
 0x210   :  { %580 = vrcp.f32 %v519_v3  ;;  %v531_v7 = vand.u32 2147483648, %v519_v3  ;;  %v529_v8 = vand.u32 2147483647, %v519_v3  ;;  %vm525_vm7 = vweird.f32 %v519_v3 }
 0x212   :  { %v532_v11 = vor.u32 1.1754944e-38, %v531_v7  ;;  %vm530_vm9 = vcmp.eq.f32.partialorder %v529_v8, 8.507059e+37 }
 0x216   :  { %v581_v51 = vpop.eup %580 }
 0x217   :  { %v521_v4 = vmul.f32 %v581_v51, %v519_v3  ;;  %vm526_vm6 = vweird.f32 %v581_v51 }
 0x218   :  { %vm527_vm8 = vmor %vm525_vm7, %vm526_vm6 }
 0x219   :  { %v522_v6 = vsub.f32 1.0, %v521_v4 }
 0x21b   :  { %v523_v5 = vmul.f32 %v581_v51, %v522_v6 }
 0x21d   :  { %v524_v10 = vadd.f32 %v581_v51, %v523_v5 }
 0x21f   :  { %v528_v2 = vsel %vm527_vm8, %v581_v51, %v524_v10 }
 0x220   :  { %v533_v12 = vsel %vm530_vm9, %v532_v11, %v528_v2 }
 0x221   :  { %v534_v60 = vmul.f32 %v579_v55, %v533_v12 }
 0x223   :  { %535 = vst.msk [vmem:[#allocation4] sm:$0xff] %vm509_vm3, %v534_v60 }
 0x224   :  { %557 = dma.vmem_to_hbm [thread:$0]  %s553_s3, 128, %s555_s28, [#allocation5]  }
 0x225   :  { %630 = dma.done.wait [#allocation3], 128  }
 0x226   :  { %631 = vsyncadd [#allocation3], 4294967168 }
 0x227   :  { %632 = dma.done.wait [#allocation5], 128  }
 0x228   :  { %633 = vsyncadd [#allocation5], 4294967168 }
 0x229   :  { %566 = vsyncpa [#allocation3], 1 }
 0x22a   :  { %567 = vsyncpa [#allocation5], 1 }

</bundles_post_ra>
